<compile_context>
chip_gen: v7x
topology: tpu7x:2x2x1
jax: 0.10.0
libtpu: 0.0.40
codegen_flags: <defaults>
</compile_context>

<pallas_src>
import functools

import jax
import jax.numpy as jnp
from jax import lax
from jax.experimental import pallas as pl
from jax.experimental.pallas import tpu as pltpu

IGNORE_INDEX = -100


def _ce_kernel(pred_ref, tgt_ref, sum_ref, cnt_ref, *, l_valid, block_l):
    # pred_ref: (1, C, block_l) float; tgt_ref: (1, 1, block_l) int32
    # sum_ref / cnt_ref: (1, 128) f32 per-block partials (written once per grid step).
    logits = pred_ref[0].astype(jnp.float32)          # (C, block_l): C sublanes, L lanes
    tgt = tgt_ref[0]                                   # (1, block_l) int32

    # In-kernel ragged-tail mask: columns past the real spatial extent may hold
    # out-of-bounds garbage -> sanitize logits and drop them from the valid mask.
    col = (lax.broadcasted_iota(jnp.int32, (1, block_l), 1)
           + pl.program_id(1) * block_l)               # global spatial index
    in_bounds = col < l_valid                           # (1, block_l) bool
    logits = jnp.where(in_bounds, logits, 0.0)

    # Numerically stable log-sum-exp over the class (sublane) axis.
    m = jnp.max(logits, axis=0, keepdims=True)           # (1, block_l)
    lse = m + jnp.log(jnp.sum(jnp.exp(logits - m), axis=0, keepdims=True))

    # Pick the target-class logit with a sublane one-hot (no lane gather needed).
    cls = lax.broadcasted_iota(jnp.int32, logits.shape, 0)
    picked = jnp.sum(jnp.where(cls == tgt, logits, 0.0), axis=0, keepdims=True)

    valid = jnp.logical_and(tgt != IGNORE_INDEX, in_bounds)
    validf = valid.astype(jnp.float32)                   # (1, block_l)
    loss = (lse - picked) * validf                        # (1, block_l)

    if block_l % 128 == 0:
        # Fold block_l lanes down to 128 with aligned static slices (cheap, no relayout).
        def lane_fold(x):
            acc = x[:, 0:128]
            for k in range(1, block_l // 128):
                acc = acc + x[:, k * 128:(k + 1) * 128]
            return acc
        sum_ref[...] = lane_fold(loss)
        cnt_ref[...] = lane_fold(validf)
    else:
        # Fallback (block_l == L, L not a multiple of 128): scalar partial in lane 0.
        lane = lax.broadcasted_iota(jnp.int32, (1, 128), 1)
        sum_ref[...] = jnp.where(lane == 0, jnp.sum(loss), 0.0)
        cnt_ref[...] = jnp.where(lane == 0, jnp.sum(validf), 0.0)


@functools.partial(jax.jit, static_argnames=("block_l",))
def ce_loss(predict, target, block_l=512):
    """predict: (N, C, *spatial) float; target: (N, 1, *spatial) integer class ids.
    Matches nn.CrossEntropyLoss(weight=None, ignore_index=-100, reduction='mean')."""
    n, c = predict.shape[0], predict.shape[1]
    pred3 = predict.reshape(n, c, -1)                    # free reshape, native NCHW layout
    tgt3 = target.reshape(n, 1, -1).astype(jnp.int32)
    l = pred3.shape[2]

    itemsize = pred3.dtype.itemsize
    if l % 128 == 0:
        # Cap the spatial tile so the double-buffered logits tile stays well under the
        # scoped-VMEM budget on every generation (v5e 16 MiB default, v7x 32 MiB scoped).
        max_l_by_vmem = max(128, ((8 * 1024 * 1024) // (2 * c * itemsize)) // 128 * 128)
        l_block = min(max(128, (block_l // 128) * 128), l, max_l_by_vmem)
    else:
        # Block equal to the full (ragged) spatial extent is always layout-legal.
        # TODO(synk): stream over L (and over C for vocab-scale classes, >=8k) with an
        # online LSE instead of taking the whole extent / class axis in one block.
        l_block = l

    grid_l = pl.cdiv(l, l_block)
    grid = (n, grid_l)
    g = n * grid_l                                       # total number of grid steps

    kernel = functools.partial(_ce_kernel, l_valid=l, block_l=l_block)
    out_spec = pl.BlockSpec((1, 128), lambda i, j: (0, i * grid_l + j))

    part_sum, part_cnt = pl.pallas_call(
        kernel,
        out_shape=(
            jax.ShapeDtypeStruct((1, g * 128), jnp.float32),
            jax.ShapeDtypeStruct((1, g * 128), jnp.float32),
        ),
        grid_spec=pltpu.PrefetchScalarGridSpec(
            num_scalar_prefetch=0,
            grid=grid,
            in_specs=[
                pl.BlockSpec((1, c, l_block), lambda i, j: (i, 0, j)),
                pl.BlockSpec((1, 1, l_block), lambda i, j: (i, 0, j)),
            ],
            out_specs=[out_spec, out_spec],
        ),
        compiler_params=pltpu.CompilerParams(
            dimension_semantics=("parallel", "parallel"),
            vmem_limit_bytes=32 * 1024 * 1024,
        ),
    )(pred3, tgt3)

    # Tree-sum of the tiny per-block partials + mean over non-ignored elements in XLA.
    # (If every target == ignore_index this is 0/0 -> NaN, same as PyTorch.)
    return part_sum.sum() / part_cnt.sum()


def _reference(predict, target):
    n, c = predict.shape[0], predict.shape[1]
    p = predict.reshape(n, c, -1).transpose(0, 2, 1).reshape(-1, c).astype(jnp.float32)
    t = target.reshape(-1).astype(jnp.int32)
    lse = jax.scipy.special.logsumexp(p, axis=-1)
    picked = jnp.take_along_axis(p, jnp.clip(t, 0, c - 1)[:, None], axis=-1)[:, 0]
    valid = t != IGNORE_INDEX
    loss = jnp.where(valid, lse - picked, 0.0)
    return jnp.sum(loss) / jnp.sum(valid.astype(jnp.float32))


if __name__ == "__main__":
    key = jax.random.PRNGKey(0)
    k1, k2, k3 = jax.random.split(key, 3)

    N, C, H, W = 2, 4, 16, 16
    predict = jax.random.normal(k1, (N, C, H, W), dtype=jnp.float32)
    target = jax.random.randint(k2, (N, 1, H, W), 0, C, dtype=jnp.int32)
    # Sprinkle a few ignore_index entries to exercise the mask.
    ignore_mask = jax.random.bernoulli(k3, 0.1, (N, 1, H, W))
    target = jnp.where(ignore_mask, IGNORE_INDEX, target)

    out = ce_loss(predict, target)
    jax.block_until_ready(out)

    ref = _reference(predict, target)
    assert jnp.allclose(out, ref, rtol=1e-5, atol=1e-5), (out, ref)

    print("KERNEL_OK")
</pallas_src>

<mosaic_0001>
module attributes {stable_mosaic.version = 11 : i64} {
  func.func @_ce_kernel(%arg0: i32, %arg1: i32, %arg2: memref<1x4x256xf32, #tpu.memory_space<vmem>>, %arg3: memref<1x1x256xi32, #tpu.memory_space<vmem>>, %arg4: memref<1x128xf32, #tpu.memory_space<vmem>>, %arg5: memref<1x128xf32, #tpu.memory_space<vmem>>) attributes {dimension_semantics = [#tpu.dimension_semantics<parallel>, #tpu.dimension_semantics<parallel>], iteration_bounds = array<i64: 2, 1>, scalar_prefetch = 0 : i64, scratch_operands = 0 : i64, tpu.core_type = #tpu.core_type<tc>, window_params = [{transform_indices = @transform_0, window_bounds = array<i64: 1, 4, 256>}, {transform_indices = @transform_1, window_bounds = array<i64: 1, 1, 256>}, {transform_indices = @transform_2, window_bounds = array<i64: 1, 128>}, {transform_indices = @transform_3, window_bounds = array<i64: 1, 128>}]} {
    %c0 = arith.constant 0 : index
    %c0_0 = arith.constant 0 : index
    %c0_1 = arith.constant 0 : index
    %0 = vector.load %arg2[%c0, %c0_0, %c0_1] : memref<1x4x256xf32, #tpu.memory_space<vmem>>, vector<1x4x256xf32>
    %1 = vector.shape_cast %0 : vector<1x4x256xf32> to vector<4x256xf32>
    %c0_2 = arith.constant 0 : index
    %c0_3 = arith.constant 0 : index
    %c0_4 = arith.constant 0 : index
    %2 = vector.load %arg3[%c0_2, %c0_3, %c0_4] : memref<1x1x256xi32, #tpu.memory_space<vmem>>, vector<1x1x256xi32>
    %3 = vector.shape_cast %2 : vector<1x1x256xi32> to vector<1x256xi32>
    %4 = tpu.iota {dimensions = array<i32: 1>} : vector<1x256xi32>
    %c256_i32 = arith.constant 256 : i32
    %5 = arith.muli %arg1, %c256_i32 : i32
    %6 = vector.broadcast %5 : i32 to vector<1x256xi32>
    %7 = arith.addi %4, %6 : vector<1x256xi32>
    %c256_i32_5 = arith.constant 256 : i32
    %8 = vector.broadcast %c256_i32_5 : i32 to vector<1x256xi32>
    %9 = arith.cmpi slt, %7, %8 : vector<1x256xi32>
    %cst = arith.constant 0.000000e+00 : f32
    %10 = vector.shape_cast %9 : vector<1x256xi1> to vector<1x256xi1>
    %11 = vector.broadcast %10 : vector<1x256xi1> to vector<4x256xi1>
    %12 = vector.broadcast %cst : f32 to vector<4x256xf32>
    %13 = arith.select %11, %1, %12 : vector<4x256xi1>, vector<4x256xf32>
    %cst_6 = arith.constant dense<0xFF800000> : vector<256xf32>
    %14 = vector.multi_reduction <maximumf>, %13, %cst_6 [0] : vector<4x256xf32> to vector<256xf32>
    %15 = vector.shape_cast %14 : vector<256xf32> to vector<1x256xf32>
    %16 = vector.broadcast %15 : vector<1x256xf32> to vector<4x256xf32>
    %17 = arith.subf %13, %16 : vector<4x256xf32>
    %18 = math.exp %17 : vector<4x256xf32>
    %cst_7 = arith.constant dense<0.000000e+00> : vector<256xf32>
    %19 = vector.multi_reduction <add>, %18, %cst_7 [0] : vector<4x256xf32> to vector<256xf32>
    %20 = vector.shape_cast %19 : vector<256xf32> to vector<1x256xf32>
    %21 = math.log %20 : vector<1x256xf32>
    %22 = arith.addf %15, %21 : vector<1x256xf32>
    %23 = tpu.iota {dimensions = array<i32: 0>} : vector<4x256xi32>
    %24 = vector.broadcast %3 : vector<1x256xi32> to vector<4x256xi32>
    %25 = arith.cmpi eq, %23, %24 : vector<4x256xi32>
    %cst_8 = arith.constant 0.000000e+00 : f32
    %26 = vector.broadcast %cst_8 : f32 to vector<4x256xf32>
    %27 = arith.select %25, %13, %26 : vector<4x256xi1>, vector<4x256xf32>
    %cst_9 = arith.constant dense<0.000000e+00> : vector<256xf32>
    %28 = vector.multi_reduction <add>, %27, %cst_9 [0] : vector<4x256xf32> to vector<256xf32>
    %29 = vector.shape_cast %28 : vector<256xf32> to vector<1x256xf32>
    %c-100_i32 = arith.constant -100 : i32
    %30 = vector.broadcast %c-100_i32 : i32 to vector<1x256xi32>
    %31 = arith.cmpi ne, %3, %30 : vector<1x256xi32>
    %32 = arith.andi %31, %9 : vector<1x256xi1>
    %33 = arith.extui %32 : vector<1x256xi1> to vector<1x256xi32>
    %34 = arith.sitofp %33 : vector<1x256xi32> to vector<1x256xf32>
    %35 = arith.subf %22, %29 : vector<1x256xf32>
    %36 = arith.mulf %35, %34 : vector<1x256xf32>
    %37 = vector.extract_strided_slice %36 {offsets = [0, 0], sizes = [1, 128], strides = [1, 1]} : vector<1x256xf32> to vector<1x128xf32>
    %38 = vector.extract_strided_slice %36 {offsets = [0, 128], sizes = [1, 128], strides = [1, 1]} : vector<1x256xf32> to vector<1x128xf32>
    %39 = arith.addf %37, %38 : vector<1x128xf32>
    %c0_10 = arith.constant 0 : index
    %c0_11 = arith.constant 0 : index
    %40 = vector.load %arg4[%c0_10, %c0_11] : memref<1x128xf32, #tpu.memory_space<vmem>>, vector<1x128xf32>
    tpu.vector_store %arg4[%c0_10, %c0_11], %39 {strides = array<i32>} : memref<1x128xf32, #tpu.memory_space<vmem>>, vector<1x128xf32>,
    %41 = vector.extract_strided_slice %34 {offsets = [0, 0], sizes = [1, 128], strides = [1, 1]} : vector<1x256xf32> to vector<1x128xf32>
    %42 = vector.extract_strided_slice %34 {offsets = [0, 128], sizes = [1, 128], strides = [1, 1]} : vector<1x256xf32> to vector<1x128xf32>
    %43 = arith.addf %41, %42 : vector<1x128xf32>
    %c0_12 = arith.constant 0 : index
    %c0_13 = arith.constant 0 : index
    %44 = vector.load %arg5[%c0_12, %c0_13] : memref<1x128xf32, #tpu.memory_space<vmem>>, vector<1x128xf32>
    tpu.vector_store %arg5[%c0_12, %c0_13], %43 {strides = array<i32>} : memref<1x128xf32, #tpu.memory_space<vmem>>, vector<1x128xf32>,
    return
  }
  func.func @transform_0(%arg0: i32, %arg1: i32) -> (i32, i32, i32) {
    %c0_i32 = arith.constant 0 : i32
    %c0_i32_0 = arith.constant 0 : i32
    return %arg0, %c0_i32, %arg1 : i32, i32, i32
  }
  func.func @transform_1(%arg0: i32, %arg1: i32) -> (i32, i32, i32) {
    %c0_i32 = arith.constant 0 : i32
    %c0_i32_0 = arith.constant 0 : i32
    return %arg0, %c0_i32, %arg1 : i32, i32, i32
  }
  func.func @transform_2(%arg0: i32, %arg1: i32) -> (i32, i32) {
    %c1_i32 = arith.constant 1 : i32
    %0 = arith.muli %arg0, %c1_i32 : i32
    %1 = arith.addi %0, %arg1 : i32
    %c0_i32 = arith.constant 0 : i32
    %c0_i32_0 = arith.constant 0 : i32
    return %c0_i32, %1 : i32, i32
  }
  func.func @transform_3(%arg0: i32, %arg1: i32) -> (i32, i32) {
    %c1_i32 = arith.constant 1 : i32
    %0 = arith.muli %arg0, %c1_i32 : i32
    %1 = arith.addi %0, %arg1 : i32
    %c0_i32 = arith.constant 0 : i32
    %c0_i32_0 = arith.constant 0 : i32
    return %c0_i32, %1 : i32, i32
  }
}

</mosaic_0001>

<bundles_post_ra>
// kernel: ce_loss.1
= control target key start
LH: loop header
LB: loop body
LE: loop exit
PB: predicated region body
PF: predicated region fallthrough
CT: control target
= control target key end

     0   :  { %s580_s12 = smov 0   ;;  %s582_s13 = smov 0   ;;  %s638_s0 = inlined_call_operand.vmem [shape: f32[2,4,256], index: 0, kind: input, shape index: {}]   ;;  %s639_s1 = inlined_call_operand.vmem [shape: s32[2,1,256], index: 1, kind: input, shape index: {}]   ;;  %s640_s2 = inlined_call_operand.vmem [shape: f32[1,256], index: 2, kind: output, shape index: {0}]   ;;  %s641_s3 = inlined_call_operand.vmem [shape: f32[1,256], index: 3, kind: output, shape index: {1}]  }
   0x1   :  { %s584_s14 = smov 0  }
   0x2 LB: > { %s26_s15 = sadd.s32 1, %s551_s13  ;;  %p489_p0 = scmp.ge.s32.totalorder %s555_s14, 1  ;;  %s555_s14 = sphi %s584_s14, %s14_s14   ;;  %s551_s13 = sphi %s582_s13, %s643_s13   ;;  %s547_s12 = sphi %s580_s12, %s642_s12  }
   0x3   : > { %p28_p1 = scmp.ge.s32.totalorder %s26_s15, 2  ;;  %p179_p2 = scmp.lt.s32.totalorder %s555_s14, 3 }
   0x5   : > { %s645_s15 = smov (%p28_p1, %s26_s15), 0  ;;  %p180_p3 = pnand %p489_p0, %p179_p2 }
   0x6   : > { %p219_p4 = scmp.lt.s32.totalorder (!%p180_p3), %s547_s12, 1  ;;  %v308_v0 = vlaneseq (!%p180_p3)  ;;  %v557_v1 = vmov (!%p180_p3), 1966171168   ;;  %vm267_vm0 = vcmask (!%p180_p3), 1043456   ;;  %v558_v5 = vmov (!%p180_p3), 1  }
   0x7   : > { %183 = sbr.rel (%p180_p3) target bundleno = 83 (0x53), region = 28  ;;  %v339_v2 = vunpack.c.l.s4 (!%p180_p3), %v557_v1  ;;  %v337_v6 = vcombine.low (!%p180_p3), %v558_v5, %v558_v5  ;;  %v559_v24 = vmov (!%p180_p3), 0.0  }
   0x8   : > { %v600_v3 = vshrl.u32 (!%p180_p3), %v308_v0, 7 }
   0x9   : > { %v340_v4 = vunpack.c.0.s8 (!%p180_p3), %v339_v2 }
   0xa   : > { %v312_v34 = vsub.s32 (!%p180_p3), 0, %v600_v3  ;;  %v316_v36 = vsub.s32 (!%p180_p3), 1, %v600_v3 }
   0xb   : > { %v343_v7 = vsub.s32 (!%p180_p3), %v340_v4, %v600_v3 }
   0xd   : > { %v344_v12 = vrot.slane (!%p180_p3), %v337_v6, %v343_v7 }
   0xe   : > { %s647_s12 = smov (!%p219_p4, %s547_s12), 1 }
   0xf   : > { %s496_s16 = sshll.u32 %s647_s12, 3  ;;  %s492_s17 = sshll.u32 %s647_s12, 1  ;;  %v351_v17 = vrot.slane %v344_v12, %v343_v7 }
  0x10   : > { %s226_s20 = scalar_lea.vmem %s638_s0, %s496_s16  ;;  %s235_s23 = scalar_lea.vmem %s639_s1, %s492_s17 }
  0x11   : > { %v247_v8 = vld [vmem:[%s226_s20] sm:$0xff]  ;;  %vm352_vm2 = vcmp.ne.s32.totalorder %v351_v17, 0  ;;  %s245_s26 = scalar_lea.vmem %s641_s3, %s647_s12  ;;  %s240_s29 = scalar_lea.vmem %s640_s2, %s647_s12 }
  0x12   : > { %v263_v9 = vcombine.high %v247_v8, %v247_v8  ;;  %v268_v10 = vsel %vm267_vm0, %v247_v8, -inf  ;;  %v248_v14 = vld [vmem:[%s235_s23] sm:$0x3] }
  0x13   : > { %v269_v11 = vrot.slane %v268_v10, 4  ;;  %vm336_vm1 = vcmp.ne.s32.totalorder %v248_v14, 4294967196  ;;  %v313_v37 = vrot.slane %v248_v14, %v312_v34  ;;  %v317_v38 = vrot.slane %v248_v14, %v316_v36 }
  0x14   : > { %v275_v13 = vsel %vm267_vm0, %v263_v9, -inf  ;;  %vm353_vm3 = vmand %vm336_vm1, %vm352_vm2 }
  0x15   : > { %v270_v15 = vmax.f32 %v268_v10, %v269_v11  ;;  %v276_v16 = vrot.slane %v275_v13, 4  ;;  %v493_v25 = vsel %vm353_vm3, 1.0, %v559_v24  ;;  %vm318_vm4 = vcmp.eq.s32.totalorder %v600_v3, %v313_v37 }
  0x16   : > { %v373_v26 = vrot.slane %v493_v25, 1  ;;  %vm319_vm5 = vcmp.eq.s32.totalorder %v600_v3, %v317_v38  ;;  %v320_v39 = vsel %vm318_vm4, %v247_v8, 0.0  ;;  %v362_v12 = vrot.slane %v493_v25, %v312_v34 }
  0x17   : > { %v271_v18 = vrot.slane %v270_v15, 2  ;;  %v277_v19 = vmax.f32 %v275_v13, %v276_v16  ;;  %v321_v42 = vsel %vm319_vm5, %v263_v9, 0.0  ;;  %v322_v45 = vsel %vm267_vm0, %v320_v39, 0.0 }
  0x18   : > { %v375_v29 = vadd.f32 %v493_v25, %v373_v26  ;;  %v329_v49 = vsel %vm267_vm0, %v321_v42, 0.0  ;;  %v323_v50 = vrot.slane %v322_v45, 4 }
  0x19   : > { %v272_v20 = vmax.f32 %v270_v15, %v271_v18  ;;  %v278_v21 = vrot.slane %v277_v19, 2  ;;  %v330_v53 = vrot.slane %v329_v49, 4  ;;  %v366_v15 = vrot.slane %v493_v25, %v316_v36 }
  0x1a   : > { %376 = vst [vmem:[%s245_s26] sm:$0x1] %v375_v29  ;;  %v324_v56 = vadd.f32 %v323_v50, %v322_v45 }
  0x1b   : > { %v273_v22 = vrot.slane %v272_v20, 1  ;;  %v279_v23 = vmax.f32 %v277_v19, %v278_v21  ;;  %v331_v59 = vadd.f32 %v330_v53, %v329_v49 }
  0x1c   : > { %v325_v62 = vrot.slane %v324_v56, 2 }
  0x1d   : > { %v274_v27 = vmax.f32 %v272_v20, %v273_v22  ;;  %v280_v28 = vrot.slane %v279_v23, 1  ;;  %v332_v0 = vrot.slane %v331_v59, 2 }
  0x1e   : > { %v326_v1 = vadd.f32 %v325_v62, %v324_v56 }
  0x1f   : > { %v281_v30 = vmax.f32 %v279_v23, %v280_v28  ;;  %v282_v31 = vsub.f32 %v247_v8, %v274_v27  ;;  %v333_v2 = vadd.f32 %v332_v0, %v331_v59 }
  0x20   : > { %v327_v3 = vrot.slane %v326_v1, 1 }
  0x21   : > { %v283_v32 = vsub.f32 %v263_v9, %v281_v30  ;;  %v284_v33 = vmul.f32 1.442695, %v282_v31  ;;  %v334_v4 = vrot.slane %v333_v2, 1 }
  0x22   : > { %v328_v7 = vadd.f32 %v327_v3, %v326_v1 }
  0x23   : > { %525 = vpow2.f32 %v284_v33  ;;  %v286_v35 = vmul.f32 1.442695, %v283_v32  ;;  %v335_v11 = vadd.f32 %v334_v4, %v333_v2 }
  0x25   : > { %527 = vpow2.f32 %v286_v35 }
  0x2d   : > { %v526_v40 = vpop.eup %525 }
  0x2e   : > { %v288_v41 = vsel %vm267_vm0, %v526_v40, 0.0 }
  0x2f   : > { %v528_v43 = vpop.eup %527  ;;  %v289_v44 = vrot.slane %v288_v41, 4 }
  0x30   : > { %v295_v46 = vsel %vm267_vm0, %v528_v43, 0.0 }
  0x31   : > { %v290_v47 = vadd.f32 %v289_v44, %v288_v41  ;;  %v296_v48 = vrot.slane %v295_v46, 4 }
  0x33   : > { %v291_v51 = vrot.slane %v290_v47, 2  ;;  %v297_v52 = vadd.f32 %v296_v48, %v295_v46 }
  0x35   : > { %v292_v54 = vadd.f32 %v291_v51, %v290_v47  ;;  %v298_v55 = vrot.slane %v297_v52, 2 }
  0x37   : > { %v293_v57 = vrot.slane %v292_v54, 1  ;;  %v299_v58 = vadd.f32 %v298_v55, %v297_v52 }
  0x39   : > { %v294_v60 = vadd.f32 %v293_v57, %v292_v54  ;;  %v300_v61 = vrot.slane %v299_v58, 1 }
  0x3b   : > { %v301_v63 = vadd.f32 %v300_v61, %v299_v58  ;;  %529 = vlog2.f32 %v294_v60 }
  0x3d   : > { %531 = vlog2.f32 %v301_v63 }
  0x45   : > { %v530_v5 = vpop.eup %529 }
  0x46   : > { %v303_v6 = vmul.f32 0.6931472, %v530_v5 }
  0x47   : > { %v532_v8 = vpop.eup %531 }
  0x48   : > { %v305_v9 = vmul.f32 0.6931472, %v532_v8  ;;  %v306_v10 = vadd.f32 %v303_v6, %v274_v27 }
  0x4a   : > { %v307_v13 = vadd.f32 %v305_v9, %v281_v30  ;;  %v356_v14 = vsub.f32 %v306_v10, %v328_v7 }
  0x4c   : > { %v357_v16 = vsub.f32 %v307_v13, %v335_v11  ;;  %v369_v17 = vmul.f32 %v362_v12, %v356_v14 }
  0x4e   : > { %v370_v18 = vmul.f32 %v366_v15, %v357_v16 }
  0x50   : > { %v371_v19 = vadd.f32 %v370_v18, %v369_v17 }
  0x52   : > { %372 = vst [vmem:[%s240_s29] sm:$0x1] %v371_v19 }
  0x53 PF: > { %s14_s14 = sadd.s32 1, %s555_s14   ;;  %s642_s12 = smov %s551_s13 }
  0x54   : > { %p11_p5 = scmp.ge.s32.totalorder %s14_s14, 4   ;;  %s643_s13 = smov %s645_s15 }
  0x56   :  { %13 = sbr.rel (!%p11_p5) target bundleno = 2 (0x2), region = 73 }

</bundles_post_ra>
